<compile_context>
chip_gen: v5e
topology: v5e:2x2
jax: 0.10.0
libtpu: 0.0.40
codegen_flags: <defaults>
</compile_context>

<pallas_src>
import numpy as np
import jax
import jax.numpy as jnp
from jax.experimental import pallas as pl
from jax.experimental.pallas import tpu as pltpu

KSIZE = 3
STRIDE = 2
PAD = 1


def _downsample1d_kernel(xp_ref, xb_ref, w01_ref, w2_ref, b_ref, o_ref, t2_ref):
    # xp_ref : (TM, 2C)  row pairs: [even | odd] channels of rows (2t, 2t+1)
    # xb_ref : (1, 1, C) even half of the first pair of the *next* tile (cross-tile boundary)
    # w01_ref: (2C, C)   fused weights for taps k=0,1
    # w2_ref : (C, C)    weights for tap k=2
    # b_ref  : (1, C)    bias (f32)
    # o_ref  : (TM, C)   output tile (channels-last)
    # t2_ref : (TM, C)   VMEM scratch holding the k=2 taps for this tile
    tm, c = o_ref.shape

    pairs = xp_ref[...]                                              # single load of the tile

    # Assemble taps k=2 (= even half of the NEXT pair): rows 0..TM-2 come from an
    # in-register slice of this tile (sublane offset 1), row TM-1 comes from the
    # precomputed boundary row of the next tile.
    t2_ref[pl.ds(0, tm - 1), :] = pairs[1:tm, 0:c]
    t2_ref[pl.ds(tm - 1, 1), :] = xb_ref[0]

    acc = jnp.dot(pairs, w01_ref[...], preferred_element_type=jnp.float32)
    acc = acc + jnp.dot(t2_ref[...], w2_ref[...], preferred_element_type=jnp.float32)
    o_ref[...] = (acc + b_ref[...]).astype(o_ref.dtype)


def _round_up(x, m):
    return (x + m - 1) // m * m


def _choose_tm(n_rows, c, itemsize):
    # Tile-dependent VMEM per row: double-buffered input pairs (2*2C) + double-buffered
    # output (2*C) + scratch (C).  Keep it well under the scoped limit (v7x-safe).
    budget = 16 * 1024 * 1024
    per_row = 7 * c * itemsize
    tm = max(8, min(1024, (budget // max(per_row, 1)) // 8 * 8))
    tm = min(tm, _round_up(max(n_rows, 1), 8))
    return max(8, tm // 8 * 8)


def downsample1d(x_ncl, weight, bias, *, compute_dtype=None):
    """Conv1d(dim, dim, 3, stride=2, padding=1) forward.

    x_ncl : (B, C, L)       PyTorch NCL layout
    weight: (C_out, C_in, 3)
    bias  : (C_out,)
    compute_dtype: optional narrower dtype (e.g. jnp.bfloat16) for the matmul inputs;
                   accumulation stays f32.
    returns (B, C, L_out) with L_out = (L + 2*PAD - KSIZE)//STRIDE + 1
    """
    B, C, L = x_ncl.shape
    L_out = (L + 2 * PAD - KSIZE) // STRIDE + 1
    seg = L_out + 1            # pairs per batch (one spare so the k=2 tap of the last kept
                               # row stays inside its own batch segment)
    rows = 2 * seg             # padded rows per batch

    # ---- glue (layout only, ~1x input bytes): NCL -> channels-last, zero-pad, pair-pack, flatten
    x = jnp.transpose(x_ncl, (0, 2, 1))                           # (B, L, C)
    x = jnp.pad(x, ((0, 0), (PAD, rows - PAD - L), (0, 0)))       # (B, 2*seg, C)
    xp = x.reshape(B, seg, 2 * C).reshape(B * seg, 2 * C)         # (N_raw, 2C) row pairs

    n_raw = B * seg
    itemsize = 4 if compute_dtype is None else jnp.dtype(compute_dtype).itemsize
    tm = _choose_tm(n_raw, C, itemsize)
    n = _round_up(n_raw, tm)
    n_tiles = n // tm
    xp = jnp.pad(xp, ((0, n - n_raw), (0, 0)))                    # (N, 2C)

    # Cross-tile boundary rows: even half of pair (m+1)*TM for tile m.  The last tile's
    # boundary only feeds a padding row that is sliced away, so clipping is safe.
    bidx = np.minimum((np.arange(n_tiles) + 1) * tm, n - 1)
    xb = xp[bidx, :C].reshape(n_tiles, 1, C)                      # (n_tiles, 1, C)

    w = jnp.transpose(weight, (2, 1, 0))                          # (K, C_in, C_out)
    w01 = jnp.concatenate([w[0], w[1]], axis=0)                   # (2C, C) fused taps 0,1
    w2 = w[2]                                                     # (C, C)  tap 2
    b2 = bias.reshape(1, C).astype(jnp.float32)

    if compute_dtype is not None:
        xp = xp.astype(compute_dtype)
        xb = xb.astype(compute_dtype)
        w01 = w01.astype(compute_dtype)
        w2 = w2.astype(compute_dtype)

    out_flat = pl.pallas_call(
        _downsample1d_kernel,
        out_shape=jax.ShapeDtypeStruct((n, C), x_ncl.dtype),
        grid=(n_tiles,),
        in_specs=[
            pl.BlockSpec((tm, 2 * C), lambda m: (m, 0)),          # pair tiles (pipelined)
            pl.BlockSpec((1, 1, C), lambda m: (m, 0, 0)),         # boundary row per tile
            pl.BlockSpec((2 * C, C), lambda m: (0, 0)),           # resident weights
            pl.BlockSpec((C, C), lambda m: (0, 0)),
            pl.BlockSpec((1, C), lambda m: (0, 0)),               # resident bias
        ],
        out_specs=pl.BlockSpec((tm, C), lambda m: (m, 0)),
        scratch_shapes=[pltpu.VMEM((tm, C), xp.dtype)],
        compiler_params=pltpu.CompilerParams(
            dimension_semantics=("parallel",),
            vmem_limit_bytes=48 * 1024 * 1024,
        ),
    )(xp, xb, w01, w2, b2)

    # Back to PyTorch NCL layout (kept as an XLA transpose; kernel stays channels-last).
    out = out_flat[:n_raw].reshape(B, seg, C)[:, :L_out]          # (B, L_out, C)
    return jnp.transpose(out, (0, 2, 1))                          # (B, C, L_out)


def _reference_conv1d(x_ncl, weight, bias):
    out = jax.lax.conv_general_dilated(
        x_ncl,
        weight,
        window_strides=(STRIDE,),
        padding=[(PAD, PAD)],
        dimension_numbers=("NCH", "OIH", "NCH"),
    )
    return out + bias[None, :, None]


if __name__ == "__main__":
    # Small shapes consistent with Downsample1d(dim=4): x is (B, dim, L).
    B, dim, L = 2, 4, 16

    key = jax.random.PRNGKey(0)
    kx, kw, kb = jax.random.split(key, 3)

    x = jax.random.normal(kx, (B, dim, L), dtype=jnp.float32)
    fan_in = dim * KSIZE
    bound = 1.0 / (fan_in ** 0.5)
    weight = jax.random.uniform(
        kw, (dim, dim, KSIZE), dtype=jnp.float32, minval=-bound, maxval=bound
    )
    bias = jax.random.uniform(
        kb, (dim,), dtype=jnp.float32, minval=-bound, maxval=bound
    )

    L_out = (L + 2 * PAD - KSIZE) // STRIDE + 1
    ref = _reference_conv1d(x, weight, bias)

    out = jax.block_until_ready(downsample1d(x, weight, bias))
    assert out.shape == (B, dim, L_out)
    assert jnp.allclose(out, ref, atol=1e-5, rtol=1e-5)

    # Optional bandwidth-saving bf16 compute path (f32 accumulation on the MXU).
    out_bf16 = jax.block_until_ready(
        downsample1d(x, weight, bias, compute_dtype=jnp.bfloat16)
    )
    assert out_bf16.shape == (B, dim, L_out)
    assert jnp.allclose(out_bf16, ref, atol=5e-2, rtol=5e-2)

    print("KERNEL_OK")
</pallas_src>

<mosaic_0001>
module attributes {stable_mosaic.version = 11 : i64} {
  func.func @_downsample1d_kernel(%arg0: i32, %arg1: memref<24x8xf32, #tpu.memory_space<vmem>>, %arg2: memref<1x1x4xf32, #tpu.memory_space<vmem>>, %arg3: memref<8x4xf32, #tpu.memory_space<vmem>>, %arg4: memref<4x4xf32, #tpu.memory_space<vmem>>, %arg5: memref<1x4xf32, #tpu.memory_space<vmem>>, %arg6: memref<24x4xf32, #tpu.memory_space<vmem>>, %arg7: memref<24x4xf32, #tpu.memory_space<vmem>>) attributes {dimension_semantics = [#tpu.dimension_semantics<parallel>], iteration_bounds = array<i64: 1>, scalar_prefetch = 0 : i64, scratch_operands = 1 : i64, tpu.core_type = #tpu.core_type<tc>, window_params = [{transform_indices = @transform_0, window_bounds = array<i64: 24, 8>}, {transform_indices = @transform_1, window_bounds = array<i64: 1, 1, 4>}, {pipeline_mode = #tpu.pipeline_mode<synchronous>, transform_indices = @transform_2, window_bounds = array<i64: 8, 4>}, {pipeline_mode = #tpu.pipeline_mode<synchronous>, transform_indices = @transform_3, window_bounds = array<i64: 4, 4>}, {pipeline_mode = #tpu.pipeline_mode<synchronous>, transform_indices = @transform_4, window_bounds = array<i64: 1, 4>}, {transform_indices = @transform_5, window_bounds = array<i64: 24, 4>}]} {
    %c0 = arith.constant 0 : index
    %c0_0 = arith.constant 0 : index
    %0 = vector.load %arg1[%c0, %c0_0] : memref<24x8xf32, #tpu.memory_space<vmem>>, vector<24x8xf32>
    %1 = vector.extract_strided_slice %0 {offsets = [1, 0], sizes = [23, 4], strides = [1, 1]} : vector<24x8xf32> to vector<23x4xf32>
    %c0_1 = arith.constant 0 : index
    %c0_2 = arith.constant 0 : index
    %2 = vector.load %arg7[%c0_1, %c0_2] : memref<24x4xf32, #tpu.memory_space<vmem>>, vector<23x4xf32>
    tpu.vector_store %arg7[%c0_1, %c0_2], %1 {strides = array<i32>} : memref<24x4xf32, #tpu.memory_space<vmem>>, vector<23x4xf32>,
    %c0_3 = arith.constant 0 : index
    %c0_4 = arith.constant 0 : index
    %c0_5 = arith.constant 0 : index
    %3 = vector.load %arg2[%c0_3, %c0_4, %c0_5] : memref<1x1x4xf32, #tpu.memory_space<vmem>>, vector<1x1x4xf32>
    %4 = vector.shape_cast %3 : vector<1x1x4xf32> to vector<1x4xf32>
    %c23 = arith.constant 23 : index
    %c0_6 = arith.constant 0 : index
    %5 = vector.load %arg7[%c23, %c0_6] : memref<24x4xf32, #tpu.memory_space<vmem>>, vector<1x4xf32>
    tpu.vector_store %arg7[%c23, %c0_6], %4 {strides = array<i32>} : memref<24x4xf32, #tpu.memory_space<vmem>>, vector<1x4xf32>,
    %c0_7 = arith.constant 0 : index
    %c0_8 = arith.constant 0 : index
    %6 = vector.load %arg3[%c0_7, %c0_8] : memref<8x4xf32, #tpu.memory_space<vmem>>, vector<8x4xf32>
    %cst = arith.constant dense<0.000000e+00> : vector<24x4xf32>
    %7 = tpu.matmul %0, %6, %cst {dimension_numbers = #tpu.dot_dimension_numbers<[1], [0], [0], [1], [0, 0, 1, 1], [], []>} : vector<24x8xf32>, vector<8x4xf32>, vector<24x4xf32> -> vector<24x4xf32>
    %c0_9 = arith.constant 0 : index
    %c0_10 = arith.constant 0 : index
    %8 = vector.load %arg7[%c0_9, %c0_10] : memref<24x4xf32, #tpu.memory_space<vmem>>, vector<24x4xf32>
    %c0_11 = arith.constant 0 : index
    %c0_12 = arith.constant 0 : index
    %9 = vector.load %arg4[%c0_11, %c0_12] : memref<4x4xf32, #tpu.memory_space<vmem>>, vector<4x4xf32>
    %cst_13 = arith.constant dense<0.000000e+00> : vector<24x4xf32>
    %10 = tpu.matmul %8, %9, %cst_13 {dimension_numbers = #tpu.dot_dimension_numbers<[1], [0], [0], [1], [0, 0, 1, 1], [], []>} : vector<24x4xf32>, vector<4x4xf32>, vector<24x4xf32> -> vector<24x4xf32>
    %11 = arith.addf %7, %10 : vector<24x4xf32>
    %c0_14 = arith.constant 0 : index
    %c0_15 = arith.constant 0 : index
    %12 = vector.load %arg5[%c0_14, %c0_15] : memref<1x4xf32, #tpu.memory_space<vmem>>, vector<1x4xf32>
    %13 = vector.broadcast %12 : vector<1x4xf32> to vector<24x4xf32>
    %14 = arith.addf %11, %13 : vector<24x4xf32>
    %c0_16 = arith.constant 0 : index
    %c0_17 = arith.constant 0 : index
    %15 = vector.load %arg6[%c0_16, %c0_17] : memref<24x4xf32, #tpu.memory_space<vmem>>, vector<24x4xf32>
    tpu.vector_store %arg6[%c0_16, %c0_17], %14 {strides = array<i32>} : memref<24x4xf32, #tpu.memory_space<vmem>>, vector<24x4xf32>,
    return
  }
  func.func @transform_0(%arg0: i32) -> (i32, i32) {
    %c0_i32 = arith.constant 0 : i32
    %c0_i32_0 = arith.constant 0 : i32
    return %arg0, %c0_i32 : i32, i32
  }
  func.func @transform_1(%arg0: i32) -> (i32, i32, i32) {
    %c0_i32 = arith.constant 0 : i32
    %c0_i32_0 = arith.constant 0 : i32
    %c0_i32_1 = arith.constant 0 : i32
    return %arg0, %c0_i32, %c0_i32_0 : i32, i32, i32
  }
  func.func @transform_2(%arg0: i32) -> (i32, i32) {
    %c0_i32 = arith.constant 0 : i32
    %c0_i32_0 = arith.constant 0 : i32
    %c0_i32_1 = arith.constant 0 : i32
    return %c0_i32, %c0_i32_0 : i32, i32
  }
  func.func @transform_3(%arg0: i32) -> (i32, i32) {
    %c0_i32 = arith.constant 0 : i32
    %c0_i32_0 = arith.constant 0 : i32
    %c0_i32_1 = arith.constant 0 : i32
    return %c0_i32, %c0_i32_0 : i32, i32
  }
  func.func @transform_4(%arg0: i32) -> (i32, i32) {
    %c0_i32 = arith.constant 0 : i32
    %c0_i32_0 = arith.constant 0 : i32
    %c0_i32_1 = arith.constant 0 : i32
    return %c0_i32, %c0_i32_0 : i32, i32
  }
  func.func @transform_5(%arg0: i32) -> (i32, i32) {
    %c0_i32 = arith.constant 0 : i32
    %c0_i32_0 = arith.constant 0 : i32
    return %arg0, %c0_i32 : i32, i32
  }
}

</mosaic_0001>

<bundles_post_ra>
// kernel: tpu_custom_call.1
= control target key start
LH: loop header
LB: loop body
LE: loop exit
PB: predicated region body
PF: predicated region fallthrough
CT: control target
= control target key end

     0   :  { %vm45_vm0 = vcmask 1043456   ;;  %vm25_vm1 = vcmask 31744   ;;  %vm75_vm2 = vcmask 64512   ;;  %vm29_vm3 = vcmask 24576   ;;  %s208_s3 = inlined_call_operand.vmem [shape: f32[4,4], index: 3, kind: input, shape index: {}]   ;;  %s209_s2 = inlined_call_operand.vmem [shape: f32[8,4], index: 2, kind: input, shape index: {}]   ;;  %s210_s0 = inlined_call_operand.vmem [shape: f32[24,8], index: 0, kind: input, shape index: {}]   ;;  %s211_s1 = inlined_call_operand.vmem [shape: f32[1,1,4], index: 1, kind: input, shape index: {}]   ;;  %s212_s4 = inlined_call_operand.vmem [shape: f32[1,4], index: 4, kind: input, shape index: {}]   ;;  %s213_s5 = inlined_call_operand.vmem [shape: f32[24,4], index: 5, kind: output, shape index: {}]  }
   0x1   :  { %v35_v0 = vld [vmem:[%s208_s3] sm:$0xf]  ;;  %v21_v2 = vld [vmem:[%s210_s0 + $0x8] sm:$0xff]  ;;  %v22_v3 = vld [vmem:[%s210_s0 + $0x10] sm:$0xff]  ;;  %vm23_vm4 = vcmask 31745  }
   0x2   :  { %v31_v1 = vld [vmem:[%s209_s2] sm:$0xff]  ;;  %132 = vmatpush.msk.msra.mxu2 %vm45_vm0, %v35_v0  ;;  %26 = vst.msk [vmem:[#allocation2 + $0x7] sm:$0xff] %vm25_vm1, %v21_v2  ;;  %125 = vmatpush.msk.msra.mxu0 %vm45_vm0, %v35_v0 }
   0x3   :  { %133 = vmatpush.msra.mxu3 %v31_v1  ;;  %v28_v4 = vld [vmem:[%s211_s1] sm:$0x1]  ;;  %27 = vst.msk [vmem:[#allocation2 + $0xf] sm:$0xff] %vm25_vm1, %v22_v3  ;;  %100 = vmatpush.msra.mxu1 %v31_v1 }
   0x4   :  { %v20_v5 = vld [vmem:[%s210_s0] sm:$0xff]  ;;  %130 = vmatmul.msk.f32.vlgmr.msra.gmra.mxu3 %vm75_vm2, %v21_v2  ;;  %30 = vst.msk [vmem:[#allocation2 + $0x17] sm:$0x1] %vm29_vm3, %v28_v4 }
   0x5   :  { %24 = vst.msk [vmem:[#allocation2 - $0x1] sm:$0xfe] %vm23_vm4, %v20_v5  ;;  %129 = vmatmul.msk.f32.vlgmr.msra.gmra.mxu1 %vm75_vm2, %v20_v5  ;;  %v134_v12 = vld [vmem:[%s212_s4] ss:$0 sm:$0xff] }
   0xa   :  { %v33_v6 = vld [vmem:[#allocation2 + $0x8] sm:$0xff] }
   0xb   :  { %127 = vmatmul.msk.f32.vlgmr.msra.gmra.mxu2 %vm25_vm1, %v33_v6  ;;  %v34_v8 = vld [vmem:[#allocation2 + $0x10] sm:$0xff] }
   0xc   :  { %131 = vmatmul.msk.f32.gmra.mxu3 %vm75_vm2, %v22_v3  ;;  %v32_v7 = vld [vmem:[#allocation2] sm:$0xff] }
   0xd   :  { %126 = vmatmul.msk.f32.vlgmr.msra.gmra.mxu0 %vm25_vm1, %v32_v7 }
  0x13   :  { %128 = vmatmul.msk.f32.gmra.mxu2 %vm25_vm1, %v34_v8 }
  0x82   :  { %v102_v9 = vpop.f32.mrf.mxu1 }
  0x87   :  { %v105_v10 = vpop.f32.mrf.mxu3 }
  0x8a   :  { %v66_v11 = vpop.f32.mrf.mxu0 }
  0x8b   :  { %v103_v13 = vadd.f32 %v102_v9, %v66_v11 }
  0x8d   :  { %v115_v14 = vadd.f32 %v134_v12, %v103_v13 }
  0x8e   :  { %v69_v15 = vpop.f32.mrf.mxu2 }
  0x8f   :  { %v106_v16 = vadd.f32 %v105_v10, %v69_v15  ;;  %118 = vst.msk [vmem:[%s213_s5] sm:$0xff] %vm25_vm1, %v115_v14  ;;  %v108_v18 = vpop.f32.mrf.mxu3 }
  0x91   :  { %v116_v17 = vadd.f32 %v134_v12, %v106_v16 }
  0x93   :  { %119 = vst.msk [vmem:[%s213_s5 + $0x8] sm:$0xff] %vm25_vm1, %v116_v17 }
  0x96   :  { %v72_v19 = vpop.f32.mrf.mxu2 }
  0x97   :  { %v109_v20 = vadd.f32 %v108_v18, %v72_v19 }
  0x99   :  { %v117_v21 = vadd.f32 %v134_v12, %v109_v20 }
  0x9b   :  { %120 = vst.msk [vmem:[%s213_s5 + $0x10] sm:$0xff] %vm25_vm1, %v117_v21 }

</bundles_post_ra>
